<compile_context>
chip_gen: v7x
topology: tpu7x:2x2x1
jax: 0.10.0
libtpu: 0.0.40
codegen_flags: <defaults>
</compile_context>

<pallas_src>
import functools
import math

import jax
import jax.numpy as jnp
from jax.experimental import pallas as pl
from jax.experimental.pallas import tpu as pltpu


# ----------------------------------------------------------------------------
# Tiling utilities
# ----------------------------------------------------------------------------
def _sublane_align(dtype):
    """Second-to-last-dim alignment: 8 for 32-bit, 16 for 16-bit, 32 for 8-bit."""
    return max(8, 32 // jnp.dtype(dtype).itemsize)


def _pick_tile(dim, max_tile, align):
    """Largest tile <= max_tile that divides `dim` and is a multiple of `align`,
    or the full dim when it already fits (full-extent blocks are always legal)."""
    if dim <= max_tile:
        return dim
    t = (max_tile // align) * align
    while t >= align:
        if dim % t == 0:
            return t
        t -= align
    return dim  # no aligned divisor: fall back to one full-size block


# ----------------------------------------------------------------------------
# Tiled linear:  y = x @ w + b
# ----------------------------------------------------------------------------
def _linear_kernel(x_ref, w_ref, b_ref, o_ref, acc_ref):
    k_i = pl.program_id(2)

    @pl.when(k_i == 0)
    def _init():
        acc_ref[...] = jnp.zeros(acc_ref.shape, acc_ref.dtype)

    acc_ref[...] += jnp.dot(x_ref[...], w_ref[...],
                            preferred_element_type=jnp.float32)

    @pl.when(k_i == pl.num_programs(2) - 1)
    def _finalize():
        # Bias added once, at the last K step, right before the cast/store.
        o_ref[...] = (acc_ref[...] + b_ref[...].astype(jnp.float32)).astype(o_ref.dtype)


def linear(x2d, w, b, *, tm_max=512, tn_max=512, tk_max=512):
    """x2d: [M, K], w: [K, N], b: [N] -> [M, N] via a pipelined, tiled matmul.

    512^3 tiles keep the double-buffered inputs + output + f32 accumulator at
    ~7-8 MiB — comfortably inside the 48 MiB VMEM limit on every chip while
    halving HBM re-reads of the x/w tiles vs. 256-wide output tiles."""
    M, K = x2d.shape
    N = w.shape[1]
    tm = _pick_tile(M, tm_max, _sublane_align(x2d.dtype))
    tn = _pick_tile(N, tn_max, 128)
    tk = _pick_tile(K, tk_max, 128)
    grid = (M // tm, N // tn, K // tk)
    return pl.pallas_call(
        _linear_kernel,
        out_shape=jax.ShapeDtypeStruct((M, N), x2d.dtype),
        grid=grid,
        in_specs=[
            pl.BlockSpec((tm, tk), lambda i, j, k: (i, k)),
            pl.BlockSpec((tk, tn), lambda i, j, k: (k, j)),
            pl.BlockSpec((1, tn), lambda i, j, k: (0, j)),
        ],
        out_specs=pl.BlockSpec((tm, tn), lambda i, j, k: (i, j)),
        scratch_shapes=[pltpu.VMEM((tm, tn), jnp.float32)],
        compiler_params=pltpu.CompilerParams(
            dimension_semantics=("parallel", "parallel", "arbitrary"),
            vmem_limit_bytes=48 * 1024 * 1024,
        ),
    )(x2d, w, b.reshape(1, N))


# ----------------------------------------------------------------------------
# Flash-style multi-head attention (online softmax over a KV grid axis)
# ----------------------------------------------------------------------------
def _flash_attn_kernel(q_ref, k_ref, v_ref, o_ref, m_sc, l_sc, acc_sc,
                       *, h_n, d_k):
    # q_ref: [1, tq, d_model]; k_ref/v_ref: [1, tkv, d_model]; o_ref: [1, tq, d_model]
    # NOTE: 1/sqrt(d_k) is pre-folded into the Q projection weights (no in-kernel scale).
    kv_i = pl.program_id(2)

    @pl.when(kv_i == 0)
    def _init():
        m_sc[...] = jnp.full(m_sc.shape, -jnp.inf, m_sc.dtype)
        l_sc[...] = jnp.zeros(l_sc.shape, l_sc.dtype)
        acc_sc[...] = jnp.zeros(acc_sc.shape, acc_sc.dtype)

    # Online-softmax update, one head (= one d_k-wide column block) at a time.
    # Operands stay in the input dtype; the MXU accumulates in f32 via
    # preferred_element_type, so bf16 inputs run at native bf16 MXU rate.
    for h in range(h_n):
        col = slice(h * d_k, (h + 1) * d_k)
        qh = q_ref[0, :, col]                                        # [tq, d_k]
        kh = k_ref[0, :, col]                                        # [tkv, d_k]
        vh = v_ref[0, :, col]                                        # [tkv, d_k]

        # Contract directly on d_k (no materialized k.T / XLU transpose).
        s = jax.lax.dot_general(qh, kh, (((1,), (1,)), ((), ())),
                                preferred_element_type=jnp.float32)  # [tq, tkv] f32

        m_prev = m_sc[h]                                             # [tq, 1]
        m_new = jnp.maximum(m_prev, jnp.max(s, axis=-1, keepdims=True))
        alpha = jnp.exp(m_prev - m_new)
        p = jnp.exp(s - m_new)                                       # [tq, tkv] f32

        l_sc[h] = alpha * l_sc[h] + jnp.sum(p, axis=-1, keepdims=True)
        m_sc[h] = m_new
        # Cast p down to the value dtype so the PV matmul also runs at native rate.
        pv = jax.lax.dot_general(p.astype(v_ref.dtype), vh, (((1,), (0,)), ((), ())),
                                 preferred_element_type=jnp.float32)  # [tq, d_k]
        acc_sc[:, col] = alpha * acc_sc[:, col] + pv

    @pl.when(kv_i == pl.num_programs(2) - 1)
    def _finalize():
        for h in range(h_n):
            col = slice(h * d_k, (h + 1) * d_k)
            # approx reciprocal runs on the EUP slot (~free); fine for inference tolerances.
            inv_l = pl.reciprocal(l_sc[h], approx=True)
            o_ref[0, :, col] = (acc_sc[:, col] * inv_l).astype(o_ref.dtype)


_FLASH_VMEM_BUDGET = 36 * 1024 * 1024  # working-set target; leaves headroom under v7x's 64 MiB


def _flash_tiles(Sq, Skv, d_model, dtype, *, tq_max=256, tkv_max=512):
    """Pick (tq, tkv) so double-buffered q/k/v/o blocks + the f32 accumulator
    stay under _FLASH_VMEM_BUDGET.  Large tkv (up to 512) amortizes the per-KV-step
    accumulator rescale on v5e/v6e; large d_model shrinks the tiles to fit v7x."""
    itemsize = jnp.dtype(dtype).itemsize
    sub = _sublane_align(dtype)
    while True:
        tq = _pick_tile(Sq, tq_max, sub)
        fixed = 2 * 2 * tq * d_model * itemsize + tq * d_model * 4  # q,o (x2 buf) + f32 acc
        if fixed <= _FLASH_VMEM_BUDGET // 2 or tq_max <= sub:
            break
        tq_max //= 2
    rem = max(_FLASH_VMEM_BUDGET - fixed, 0)
    tkv_cap = max(sub, rem // (2 * 2 * d_model * itemsize))         # k,v (x2 buf)
    tkv = _pick_tile(Skv, min(tkv_max, tkv_cap), sub)
    return tq, tkv


def flash_mha(q, k, v, h_n):
    """q: [B, Sq, d_model], k/v: [B, Skv, d_model] -> [B, Sq, d_model].

    Heads are contiguous d_k column blocks of d_model (same packing as the
    PyTorch view(B, S, h_n, d_k)), so input/output blocks stay lane-dense.
    Grid axes (B, Sq//tq) are 'parallel' so they shard across both v7x cores."""
    B, Sq, d_model = q.shape
    Skv = k.shape[1]
    d_k = d_model // h_n
    tq, tkv = _flash_tiles(Sq, Skv, d_model, q.dtype)
    kernel = functools.partial(_flash_attn_kernel, h_n=h_n, d_k=d_k)
    return pl.pallas_call(
        kernel,
        out_shape=jax.ShapeDtypeStruct((B, Sq, d_model), q.dtype),
        grid=(B, Sq // tq, Skv // tkv),
        in_specs=[
            pl.BlockSpec((1, tq, d_model), lambda b, qi, ki: (b, qi, 0)),
            pl.BlockSpec((1, tkv, d_model), lambda b, qi, ki: (b, ki, 0)),
            pl.BlockSpec((1, tkv, d_model), lambda b, qi, ki: (b, ki, 0)),
        ],
        out_specs=pl.BlockSpec((1, tq, d_model), lambda b, qi, ki: (b, qi, 0)),
        scratch_shapes=[
            pltpu.VMEM((h_n, tq, 1), jnp.float32),    # running max per head
            pltpu.VMEM((h_n, tq, 1), jnp.float32),    # running sum per head
            pltpu.VMEM((tq, d_model), jnp.float32),   # lane-dense f32 accumulator
        ],
        compiler_params=pltpu.CompilerParams(
            dimension_semantics=("parallel", "parallel", "arbitrary"),
            vmem_limit_bytes=48 * 1024 * 1024,
        ),
    )(q, k, v)


# ----------------------------------------------------------------------------
# Parameters
# ----------------------------------------------------------------------------
def init_params(key, d_model):
    """Deterministic parameter init (mimics nn.Linear default init).
    w* stored as [d_model, d_model] so y = x @ w + b (i.e. w = W_torch.T)."""
    bound = 1.0 / math.sqrt(d_model)
    names = ["q", "k", "v", "o"]
    params = {}
    keys = jax.random.split(key, 2 * len(names))
    for i, n in enumerate(names):
        wk, bk = keys[2 * i], keys[2 * i + 1]
        params[f"w{n}"] = jax.random.uniform(
            wk, (d_model, d_model), jnp.float32, -bound, bound)
        params[f"b{n}"] = jax.random.uniform(
            bk, (d_model,), jnp.float32, -bound, bound)
    return params


def prepare_params(params, h_n):
    """One-time transform (do NOT repeat per forward call):
      * fold the 1/sqrt(d_k) softmax scale into the Q projection weight/bias,
      * pre-fuse the Q/K/V projections into one [d_model, 3*d_model] matmul
        used by the self-attention fast path."""
    d_model = params["wq"].shape[0]
    scale = 1.0 / math.sqrt(d_model // h_n)
    prepared = dict(params)
    prepared["wq"] = params["wq"] * scale
    prepared["bq"] = params["bq"] * scale
    prepared["w_qkv"] = jnp.concatenate(
        [prepared["wq"], params["wk"], params["wv"]], axis=1)
    prepared["b_qkv"] = jnp.concatenate(
        [prepared["bq"], params["bk"], params["bv"]], axis=0)
    return prepared


# ----------------------------------------------------------------------------
# MultiHeadAttention forward (glue in plain JAX, hot paths in Pallas)
# ----------------------------------------------------------------------------
def multi_head_attention(prepared, query, key, value, h_n):
    """
    prepared: output of prepare_params (scaled wq/bq, pre-fused w_qkv/b_qkv, wo/bo)
    query: [B, Sq, d_model]; key/value: [B, Skv, d_model]
    """
    B, Sq, d_model = query.shape

    # NOTE: fast path keys on Python object identity; equal-but-distinct arrays
    # take the (still correct) separate-projection path.
    if (query is key) and (key is value):
        # Self-attention: fused Q/K/V projection -> one big tiled matmul
        # (3x larger N, LHS tile reused across all three projections).
        qkv = linear(query.reshape(B * Sq, d_model),
                     prepared["w_qkv"], prepared["b_qkv"])            # [B*Sq, 3*d_model]
        q = qkv[:, 0 * d_model:1 * d_model].reshape(B, Sq, d_model)
        k = qkv[:, 1 * d_model:2 * d_model].reshape(B, Sq, d_model)
        v = qkv[:, 2 * d_model:3 * d_model].reshape(B, Sq, d_model)
    else:
        Skv = key.shape[1]
        q = linear(query.reshape(B * Sq, d_model), prepared["wq"], prepared["bq"]).reshape(B, Sq, d_model)
        k = linear(key.reshape(B * Skv, d_model), prepared["wk"], prepared["bk"]).reshape(B, Skv, d_model)
        v = linear(value.reshape(B * Skv, d_model), prepared["wv"], prepared["bv"]).reshape(B, Skv, d_model)

    ctx = flash_mha(q, k, v, h_n)                                     # [B, Sq, d_model]
    out = linear(ctx.reshape(B * Sq, d_model), prepared["wo"], prepared["bo"])
    return out.reshape(B, Sq, d_model)


# ----------------------------------------------------------------------------
# Plain-JAX reference (same math as the PyTorch module, no Pallas)
# ----------------------------------------------------------------------------
def ref_mha(params, query, key, value, h_n):
    B, Sq, d_model = query.shape
    d_k = d_model // h_n

    def proj(x, w, b):
        y = x.reshape(-1, d_model) @ w + b
        return y.reshape(x.shape[0], x.shape[1], h_n, d_k).transpose(0, 2, 1, 3)

    q = proj(query, params["wq"], params["bq"])
    k = proj(key, params["wk"], params["bk"])
    v = proj(value, params["wv"], params["bv"])
    s = jnp.einsum("bhqd,bhkd->bhqk", q, k) / math.sqrt(d_k)
    p = jax.nn.softmax(s, axis=-1)
    ctx = jnp.einsum("bhqk,bhkd->bhqd", p, v)
    ctx = ctx.transpose(0, 2, 1, 3).reshape(B * Sq, d_model)
    return (ctx @ params["wo"] + params["bo"]).reshape(B, Sq, d_model)


if __name__ == "__main__":
    B, S, d_model, h_n = 2, 8, 32, 4

    root = jax.random.PRNGKey(0)
    kp, kx, kq, kk, kv = jax.random.split(root, 5)
    params = init_params(kp, d_model)
    prepared = prepare_params(params, h_n)   # one-time: scale-fold + QKV fuse

    # --- self-attention (query is key is value): exercises the fused-QKV path ---
    x = jax.random.normal(kx, (B, S, d_model), jnp.float32)
    out_self = jax.block_until_ready(multi_head_attention(prepared, x, x, x, h_n))
    ref_self = ref_mha(params, x, x, x, h_n)
    assert jnp.allclose(out_self, ref_self, atol=1e-2, rtol=1e-2), "self-attn mismatch"

    # --- distinct q/k/v: exercises the separate-projection path ---
    q_in = jax.random.normal(kq, (B, S, d_model), jnp.float32)
    k_in = jax.random.normal(kk, (B, S, d_model), jnp.float32)
    v_in = jax.random.normal(kv, (B, S, d_model), jnp.float32)
    out_x = jax.block_until_ready(multi_head_attention(prepared, q_in, k_in, v_in, h_n))
    ref_x = ref_mha(params, q_in, k_in, v_in, h_n)
    assert jnp.allclose(out_x, ref_x, atol=1e-2, rtol=1e-2), "cross-attn mismatch"

    print("KERNEL_OK")
</pallas_src>

<mosaic_0001>
module attributes {stable_mosaic.version = 11 : i64} {
  func.func @_linear_kernel(%arg0: i32, %arg1: i32, %arg2: i32, %arg3: memref<16x32xf32, #tpu.memory_space<vmem>>, %arg4: memref<32x96xf32, #tpu.memory_space<vmem>>, %arg5: memref<1x96xf32, #tpu.memory_space<vmem>>, %arg6: memref<16x96xf32, #tpu.memory_space<vmem>>, %arg7: memref<16x96xf32, #tpu.memory_space<vmem>>) attributes {dimension_semantics = [#tpu.dimension_semantics<parallel>, #tpu.dimension_semantics<parallel>, #tpu.dimension_semantics<arbitrary>], iteration_bounds = array<i64: 1, 1, 1>, scalar_prefetch = 0 : i64, scratch_operands = 1 : i64, tpu.core_type = #tpu.core_type<tc>, window_params = [{transform_indices = @transform_0, window_bounds = array<i64: 16, 32>}, {transform_indices = @transform_1, window_bounds = array<i64: 32, 96>}, {transform_indices = @transform_2, window_bounds = array<i64: 1, 96>}, {transform_indices = @transform_3, window_bounds = array<i64: 16, 96>}]} {
    %c0_i32 = arith.constant 0 : i32
    %0 = arith.cmpi eq, %arg2, %c0_i32 : i32
    %1 = arith.extui %0 : i1 to i32
    %c0_i32_0 = arith.constant 0 : i32
    %2 = arith.cmpi ne, %1, %c0_i32_0 : i32
    scf.if %2 {
      %cst_10 = arith.constant 0.000000e+00 : f32
      %12 = vector.broadcast %cst_10 : f32 to vector<16x96xf32>
      %c0_11 = arith.constant 0 : index
      %c0_12 = arith.constant 0 : index
      %13 = vector.load %arg7[%c0_11, %c0_12] : memref<16x96xf32, #tpu.memory_space<vmem>>, vector<16x96xf32>
      tpu.vector_store %arg7[%c0_11, %c0_12], %12 {strides = array<i32>} : memref<16x96xf32, #tpu.memory_space<vmem>>, vector<16x96xf32>,
    } else {
    }
    %c0 = arith.constant 0 : index
    %c0_1 = arith.constant 0 : index
    %3 = vector.load %arg7[%c0, %c0_1] : memref<16x96xf32, #tpu.memory_space<vmem>>, vector<16x96xf32>
    %c0_2 = arith.constant 0 : index
    %c0_3 = arith.constant 0 : index
    %4 = vector.load %arg3[%c0_2, %c0_3] : memref<16x32xf32, #tpu.memory_space<vmem>>, vector<16x32xf32>
    %c0_4 = arith.constant 0 : index
    %c0_5 = arith.constant 0 : index
    %5 = vector.load %arg4[%c0_4, %c0_5] : memref<32x96xf32, #tpu.memory_space<vmem>>, vector<32x96xf32>
    %cst = arith.constant dense<0.000000e+00> : vector<16x96xf32>
    %6 = tpu.matmul %4, %5, %cst {dimension_numbers = #tpu.dot_dimension_numbers<[1], [0], [0], [1], [0, 0, 1, 1], [], []>} : vector<16x32xf32>, vector<32x96xf32>, vector<16x96xf32> -> vector<16x96xf32>
    %7 = arith.addf %3, %6 : vector<16x96xf32>
    %c0_6 = arith.constant 0 : index
    %c0_7 = arith.constant 0 : index
    %8 = vector.load %arg7[%c0_6, %c0_7] : memref<16x96xf32, #tpu.memory_space<vmem>>, vector<16x96xf32>
    tpu.vector_store %arg7[%c0_6, %c0_7], %7 {strides = array<i32>} : memref<16x96xf32, #tpu.memory_space<vmem>>, vector<16x96xf32>,
    %c0_i32_8 = arith.constant 0 : i32
    %9 = arith.cmpi eq, %arg2, %c0_i32_8 : i32
    %10 = arith.extui %9 : i1 to i32
    %c0_i32_9 = arith.constant 0 : i32
    %11 = arith.cmpi ne, %10, %c0_i32_9 : i32
    scf.if %11 {
      %c0_10 = arith.constant 0 : index
      %c0_11 = arith.constant 0 : index
      %12 = vector.load %arg7[%c0_10, %c0_11] : memref<16x96xf32, #tpu.memory_space<vmem>>, vector<16x96xf32>
      %c0_12 = arith.constant 0 : index
      %c0_13 = arith.constant 0 : index
      %13 = vector.load %arg5[%c0_12, %c0_13] : memref<1x96xf32, #tpu.memory_space<vmem>>, vector<1x96xf32>
      %14 = vector.broadcast %13 : vector<1x96xf32> to vector<16x96xf32>
      %15 = arith.addf %12, %14 : vector<16x96xf32>
      %c0_14 = arith.constant 0 : index
      %c0_15 = arith.constant 0 : index
      %16 = vector.load %arg6[%c0_14, %c0_15] : memref<16x96xf32, #tpu.memory_space<vmem>>, vector<16x96xf32>
      tpu.vector_store %arg6[%c0_14, %c0_15], %15 {strides = array<i32>} : memref<16x96xf32, #tpu.memory_space<vmem>>, vector<16x96xf32>,
    } else {
    }
    return
  }
  func.func @transform_0(%arg0: i32, %arg1: i32, %arg2: i32) -> (i32, i32) {
    %c0_i32 = arith.constant 0 : i32
    return %arg0, %arg2 : i32, i32
  }
  func.func @transform_1(%arg0: i32, %arg1: i32, %arg2: i32) -> (i32, i32) {
    %c0_i32 = arith.constant 0 : i32
    return %arg2, %arg1 : i32, i32
  }
  func.func @transform_2(%arg0: i32, %arg1: i32, %arg2: i32) -> (i32, i32) {
    %c0_i32 = arith.constant 0 : i32
    %c0_i32_0 = arith.constant 0 : i32
    return %c0_i32, %arg1 : i32, i32
  }
  func.func @transform_3(%arg0: i32, %arg1: i32, %arg2: i32) -> (i32, i32) {
    %c0_i32 = arith.constant 0 : i32
    return %arg0, %arg1 : i32, i32
  }
}

</mosaic_0001>

<bundles_post_ra>
// kernel: tpu_custom_call.1
= control target key start
LH: loop header
LB: loop body
LE: loop exit
PB: predicated region body
PF: predicated region fallthrough
CT: control target
= control target key end

     0   :  { %8 = vsyncpa [#allocation4], 0  ;;  %s365_s0 = inlined_call_operand.hbm [shape: f32[16,32], index: 0, kind: input, shape index: {}]   ;;  %s366_s1 = inlined_call_operand.hbm [shape: f32[32,96], index: 1, kind: input, shape index: {}]   ;;  %s367_s2 = inlined_call_operand.vmem [shape: f32[1,96], index: 2, kind: input, shape index: {}]   ;;  %s368_s3 = inlined_call_operand.hbm [shape: f32[16,96], index: 3, kind: output, shape index: {}]  }
   0x1   :  { %9 = vsyncpa [#allocation7], 0 }
   0x2   :  { %10 = vsyncpa [#allocation5], 0  ;;  %s285_s12 = smov [#allocation3]   ;;  %s213_s16 = scalar_lea.hbm %s365_s0, 256 }
   0x3   :  { %s16_s13 = sshll.u32 %s285_s12, 4  ;;  %p214_p0 = scmp.ne.s32.totalorder %s365_s0, %s213_s16  ;;  %s17_s13 = int_to_ptr.vmem [resolvable:$true] %s16_s13 }
   0x4   :  { %p217_p1 = scmp.lt.u32.totalorder %s213_s16, %s365_s0 }
   0x6   :  { %p219_p2 = pnand %p217_p1, %p214_p0 }
   0x8   :  { %222 = shalt.err (!%p219_p2)
}
   0x9   :  { %s223_s21 = scalar_lea.vmem %s17_s13, 256  ;;  %p228_p4 = scmp.lt.s32.totalorder %s17_s13, %s17_s13 }
   0xa   :  { %p224_p3 = scmp.ne.s32.totalorder %s17_s13, %s223_s21  ;;  %p229_p5 = scmp.lt.s32.totalorder %s223_s21, %s223_s21 }
   0xc   :  { %p230_p6 = por %p229_p5, %p228_p4 }
   0xe   :  { %p231_p7 = pnand %p230_p6, %p224_p3 }
  0x10   :  { %234 = shalt.err (!%p231_p7)
}
  0x11   :  { %s286_s22 = smov 128   ;;  %s287_s23 = smov 8  }
  0x12   :  { %22 = dma.hbm_to_vmem [thread:$0]  %s365_s0, 256, %s17_s13, [#allocation4], %s286_s22, %s286_s22, %s287_s23  }
  0x13   :  { %s288_s26 = smov [#allocation6]   ;;  %s235_s30 = scalar_lea.hbm %s366_s1, 512 }
  0x14   :  { %s28_s27 = sshll.u32 %s288_s26, 4  ;;  %p236_p8 = scmp.ne.s32.totalorder %s366_s1, %s235_s30  ;;  %s29_s27 = int_to_ptr.vmem [resolvable:$true] %s28_s27 }
  0x15   :  { %p239_p9 = scmp.lt.u32.totalorder %s235_s30, %s366_s1 }
  0x17   :  { %p241_p10 = pnand %p239_p9, %p236_p8 }
  0x19   :  { %244 = shalt.err (!%p241_p10)
}
  0x1a   :  { %s245_s8 = scalar_lea.vmem %s29_s27, 512  ;;  %p250_p12 = scmp.lt.s32.totalorder %s29_s27, %s29_s27 }
  0x1b   :  { %p246_p11 = scmp.ne.s32.totalorder %s29_s27, %s245_s8  ;;  %p251_p13 = scmp.lt.s32.totalorder %s245_s8, %s245_s8 }
  0x1d   :  { %p252_p0 = por %p251_p13, %p250_p12 }
  0x1f   :  { %p253_p1 = pnand %p252_p0, %p246_p11 }
  0x21   :  { %256 = shalt.err (!%p253_p1)
}
  0x22   :  { %34 = dma.hbm_to_vmem [thread:$0]  %s366_s1, 512, %s29_s27, [#allocation7], %s286_s22, %s286_s22, %s287_s23  }
  0x23   :  { %279 = dma.done.wait [#allocation4], 256  }
  0x24   :  { %280 = vsyncadd [#allocation4], 4294967040 }
  0x25   :  { %281 = dma.done.wait [#allocation7], 512  }
  0x26   :  { %282 = vsyncadd [#allocation7], 4294966784  ;;  %vm47_vm0 = vcmask 785408   ;;  %v289_v0 = vmov 0.0   ;;  %vm58_vm1 = vcmask 261120   ;;  %v54_v1 = vld [vmem:[#allocation6] sm:$0xff] }
  0x27   :  { %49 = vst.msk [vmem:[#allocation2 + $0x8] sm:$0xff] %vm47_vm0, %v289_v0  ;;  %48 = vst.msk [vmem:[#allocation2] sm:$0xff] %vm47_vm0, %v289_v0  ;;  %v55_v2 = vld [vmem:[#allocation6 + $0x8] sm:$0xff]  ;;  %v56_v3 = vld [vmem:[#allocation6 + $0x10] sm:$0xff]  ;;  %s290_s11 = smov [#allocation8]  }
  0x28   :  { %v199_v4 = vpack.c.bf16 %v55_v2, %v54_v1  ;;  %v57_v5 = vld [vmem:[#allocation6 + $0x18] sm:$0xff]  ;;  %v52_v6 = vld [vmem:[#allocation3] sm:$0xff]  ;;  %v181_v15 = vld [vmem:[%s367_s2] ss:$0 sm:$0xff]  ;;  %s166_s12 = sshll.u32 %s290_s11, 4  ;;  %s167_s12 = int_to_ptr.vmem [resolvable:$true] %s166_s12 }
  0x29   :  { %v203_v7 = vpack.c.bf16 %v57_v5, %v56_v3  ;;  %196 = vmatprep.mubr.msk.f32.mxu0 %vm58_vm1, %v52_v6  ;;  %v53_v8 = vld [vmem:[#allocation3 + $0x8] sm:$0xff]  ;;  %s257_s13 = scalar_lea.vmem %s167_s12, 256  ;;  %p262_p3 = scmp.lt.s32.totalorder %s167_s12, %s167_s12 }
  0x2a   :  { %200 = vmatprep.subr.bf16.mxu0 %v199_v4  ;;  %p258_p2 = scmp.ne.s32.totalorder %s167_s12, %s257_s13  ;;  %p263_p4 = scmp.lt.s32.totalorder %s257_s13, %s257_s13 }
  0x2b   :  { %202 = vmatpush3.bf16.msra.mxu0 %v199_v4 }
  0x2c   :  { %204 = vmatprep.subr.bf16.mxu0 %v203_v7  ;;  %p264_p5 = por %p263_p4, %p262_p3 }
  0x2e   :  { %v51_v9 = vld [vmem:[#allocation2 + $0x8] sm:$0xff]  ;;  %v50_v10 = vld [vmem:[#allocation2] sm:$0xff]  ;;  %p265_p6 = pnand %p264_p5, %p258_p2 }
  0x2f   :  { %206 = vmatpush3.bf16.msra.mxu0 %v203_v7 }
  0x32   :  { %197 = vmatmul.mubr.msk.f32.vlgmr.msra.gmra.mrb[0].mxu0 %vm58_vm1, %v53_v8 }
 0x105   :  { %v198_v11 = vpop.f32.mrb[0].mxu0 }
 0x106   :  { %v141_v12 = vadd.f32 %v198_v11, %v51_v9  ;;  %v131_v13 = vpop.f32.mrb[1].mxu0 }
 0x107   :  { %v140_v14 = vadd.f32 %v131_v13, %v50_v10 }
 0x108   :  { %144 = vst.msk [vmem:[#allocation2 + $0x8] sm:$0xff] %vm47_vm0, %v141_v12 }
 0x109   :  { %143 = vst.msk [vmem:[#allocation2] sm:$0xff] %vm47_vm0, %v140_v14 }
 0x10f   :  { %v149_v16 = vld [vmem:[#allocation2 + $0x8] sm:$0xff] }
 0x110   :  { %v148_v17 = vld [vmem:[#allocation2] sm:$0xff]  ;;  %v158_v18 = vadd.f32 %v181_v15, %v149_v16 }
 0x111   :  { %v157_v19 = vadd.f32 %v181_v15, %v148_v17 }
 0x112   :  { %160 = vst.msk [vmem:[#allocation8 + $0x8] sm:$0xff] %vm47_vm0, %v158_v18 }
 0x113   :  { %159 = vst.msk [vmem:[#allocation8] sm:$0xff] %vm47_vm0, %v157_v19 }
 0x114   :  { %268 = shalt.err (!%p265_p6)
}
 0x115   :  { %s269_s15 = scalar_lea.hbm %s368_s3, 256 }
 0x116   :  { %p270_p7 = scmp.ne.s32.totalorder %s368_s3, %s269_s15  ;;  %p273_p8 = scmp.lt.u32.totalorder %s269_s15, %s368_s3 }
 0x118   :  { %p275_p9 = pnand %p273_p8, %p270_p7 }
 0x11a   :  { %278 = shalt.err (!%p275_p9)
}
 0x11b   :  { %172 = dma.vmem_to_hbm [thread:$0]  %s167_s12, 256, %s368_s3, [#allocation5], %s286_s22, %s286_s22, %s287_s23  }
 0x11c   :  { %283 = dma.done.wait [#allocation5], 256  }
 0x11d   :  { %284 = vsyncadd [#allocation5], 4294967040 }
 0x11e   :  { %176 = vsyncpa [#allocation4], 1 }
 0x11f   :  { %177 = vsyncpa [#allocation7], 1 }
 0x120   :  { %178 = vsyncpa [#allocation5], 1 }

</bundles_post_ra>
